<compile_context>
chip_gen: v7x
topology: tpu7x:2x2x1
jax: 0.10.0
libtpu: 0.0.40
codegen_flags: <defaults>
</compile_context>

<pallas_src>
import functools
import math

import jax
import jax.numpy as jnp
from jax import lax
from jax.experimental import pallas as pl
from jax.experimental.pallas import tpu as pltpu

LANE = 128


def _round_up(a, m):
    return ((a + m - 1) // m) * m


def _lif_kernel(x_ref, o_ref, *, timesteps, vth, tau, delta_t, alpha, r_sub):
    """x_ref/o_ref: (T, rows_per_block, 128) VMEM tiles.

    Outer loop over r_sub-row sub-tiles (membrane carry stays vreg-resident),
    inner (unrolled) loop is the sequential LIF recurrence over T.
    """
    beta = math.exp(-delta_t / tau)            # torch.exp(-delta_t / tau)
    one_minus_beta = 1.0 - beta
    thresh = alpha * vth                       # fire when mem >= alpha * Vth
    out_val = vth / delta_t                    # emitted spike value

    rows_per_block = x_ref.shape[1]
    n_sub = rows_per_block // r_sub
    # Full unroll only for small T; partial unroll otherwise to bound code
    # size / vreg live ranges.
    unroll_t = True if timesteps <= 16 else 4

    def sub_tile(s, carry):
        r0 = pl.multiple_of(s * r_sub, r_sub)

        def step(t, mem):
            cur = x_ref[pl.ds(t, 1), pl.ds(r0, r_sub), :].astype(jnp.float32)
            mem = beta * mem + one_minus_beta * cur          # leaky integrate
            fired = mem >= thresh
            o_ref[pl.ds(t, 1), pl.ds(r0, r_sub), :] = jnp.where(
                fired, out_val, 0.0).astype(o_ref.dtype)     # spike / delta_t
            mem = mem - jnp.where(fired, vth, 0.0)           # soft reset by Vth
            return mem

        lax.fori_loop(0, timesteps, step,
                      jnp.zeros((1, r_sub, LANE), jnp.float32),
                      unroll=unroll_t)
        return carry

    lax.fori_loop(0, n_sub, sub_tile, 0)


def lif_neuron_forward(x, *, timesteps, Vth, tau, delta_t, alpha, Vth_bound,
                       max_block_bytes=4 << 20):
    """Pallas implementation of LIFNeuron.forward (inference).

    x: (timesteps * B, C, H, W). Returns same shape/dtype.
    """
    # Vth clamp done in LIFNeuron.forward before LIFFunction:
    #   Vth <- relu(Vth - Vth_bound) + Vth_bound == max(Vth, Vth_bound)
    vth_eff = float(max(Vth - Vth_bound, 0.0) + Vth_bound)

    tb = x.shape[0]
    chw = x.shape[1:]
    assert tb % timesteps == 0, "leading dim must be timesteps * batch"
    feat = (tb // timesteps) * int(math.prod(chw))

    dtype = x.dtype                     # keep I/O dtype (bf16 stays bf16)
    itemsize = jnp.dtype(dtype).itemsize
    # Sub-tile height matched to packed-sublane vreg: 8 rows for 32-bit,
    # 16 for bf16, 32 for int8 -> unstrided, fully packed loads/stores.
    r_sub = 8 * max(1, 4 // itemsize)

    x2 = x.reshape(timesteps, feat)

    # --- tile selection: lane-dense rows of 128, sublane-aligned blocks ---
    rows = pl.cdiv(feat, LANE)
    rows_aligned = _round_up(rows, r_sub)
    # cap so one block stays ~max_block_bytes (2 specs x 2 buffers << 32 MiB)
    rows_cap = max(r_sub,
                   (max_block_bytes // (timesteps * LANE * itemsize))
                   // r_sub * r_sub)
    nb = pl.cdiv(rows_aligned, rows_cap)
    if rows_aligned >= 2 * r_sub:
        nb = max(nb, 2)        # >= 2 grid steps so megacore can shard them
    rows_per_block = _round_up(pl.cdiv(rows_aligned, nb), r_sub)
    rows_pad = rows_per_block * nb
    feat_pad = rows_pad * LANE

    if feat_pad != feat:
        x2 = jnp.pad(x2, ((0, 0), (0, feat_pad - feat)))
    x3 = x2.reshape(timesteps, rows_pad, LANE)

    kernel = functools.partial(
        _lif_kernel,
        timesteps=timesteps, vth=vth_eff, tau=float(tau),
        delta_t=float(delta_t), alpha=float(alpha), r_sub=r_sub)

    out3 = pl.pallas_call(
        kernel,
        out_shape=jax.ShapeDtypeStruct((timesteps, rows_pad, LANE), dtype),
        grid_spec=pltpu.PrefetchScalarGridSpec(
            num_scalar_prefetch=0,
            grid=(nb,),
            in_specs=[pl.BlockSpec((timesteps, rows_per_block, LANE),
                                   lambda i: (0, i, 0))],
            out_specs=pl.BlockSpec((timesteps, rows_per_block, LANE),
                                   lambda i: (0, i, 0)),
        ),
        compiler_params=pltpu.CompilerParams(
            dimension_semantics=("parallel",),
            vmem_limit_bytes=32 * 1024 * 1024),
    )(x3)

    out2 = out3.reshape(timesteps, feat_pad)
    if feat_pad != feat:
        out2 = out2[:, :feat]
    return out2.reshape(tb, *chw)


def _reference_lif(x, *, timesteps, Vth, tau, delta_t, alpha, Vth_bound):
    """Pure-JAX reference mirroring LIFFunction.forward."""
    vth = max(Vth - Vth_bound, 0.0) + Vth_bound
    tb = x.shape[0]
    chw = x.shape[1:]
    xr = x.reshape(timesteps, tb // timesteps, *chw)
    beta = math.exp(-delta_t / tau)
    mem = jnp.zeros(xr.shape[1:], jnp.float32)
    spikes = []
    for t in range(timesteps):
        mem = beta * mem + (1.0 - beta) * xr[t]
        spike = jnp.where(mem >= alpha * vth, vth, 0.0)
        mem = mem - spike
        spikes.append(spike / delta_t)
    return jnp.concatenate(spikes, 0)


if __name__ == "__main__":
    # snn_setting (deterministic, synthetic)
    snn_setting = dict(timesteps=8, Vth=0.3, tau=0.25, delta_t=0.05,
                       alpha=0.3, Vth_bound=0.0005, train_Vth=True,
                       rate_stat=False)

    T = snn_setting['timesteps']
    B, C, H, W = 2, 4, 16, 16     # input shape (T*B, C, H, W) = (16, 4, 16, 16)

    key = jax.random.PRNGKey(0)
    x = jax.random.uniform(key, (T * B, C, H, W), dtype=jnp.float32,
                           minval=0.0, maxval=2.0)

    out = lif_neuron_forward(
        x,
        timesteps=T,
        Vth=snn_setting['Vth'],
        tau=snn_setting['tau'],
        delta_t=snn_setting['delta_t'],
        alpha=snn_setting['alpha'],
        Vth_bound=snn_setting['Vth_bound'],
    )
    out = jax.block_until_ready(out)

    ref = _reference_lif(
        x,
        timesteps=T,
        Vth=snn_setting['Vth'],
        tau=snn_setting['tau'],
        delta_t=snn_setting['delta_t'],
        alpha=snn_setting['alpha'],
        Vth_bound=snn_setting['Vth_bound'],
    )
    assert out.shape == x.shape and out.dtype == x.dtype
    assert jnp.allclose(out, ref, atol=1e-5, rtol=1e-5)

    # TODO(synk): rate_stat / RateStatus bookkeeping (eval-time firing-rate
    # pool) and LIFFunction.backward (training-only, uses dist.all_reduce)
    # are host-side / autograd state, not a forward kernel; omitted.
    print("KERNEL_OK")
</pallas_src>

<mosaic_0001>
module attributes {stable_mosaic.version = 11 : i64} {
  func.func @_lif_kernel(%arg0: i32, %arg1: memref<8x8x128xf32, #tpu.memory_space<vmem>>, %arg2: memref<8x8x128xf32, #tpu.memory_space<vmem>>) attributes {dimension_semantics = [#tpu.dimension_semantics<parallel>], iteration_bounds = array<i64: 2>, scalar_prefetch = 0 : i64, scratch_operands = 0 : i64, tpu.core_type = #tpu.core_type<tc>, window_params = [{transform_indices = @transform_0, window_bounds = array<i64: 8, 8, 128>}, {transform_indices = @transform_1, window_bounds = array<i64: 8, 8, 128>}]} {
    %c0_i32 = arith.constant 0 : i32
    %c8_i32 = arith.constant 8 : i32
    %0 = arith.muli %c0_i32, %c8_i32 : i32
    %1 = tpu.assume_multiple %0, 8 : i32
    %cst = arith.constant 0.000000e+00 : f32
    %2 = vector.broadcast %cst : f32 to vector<1x8x128xf32>
    %c0_i32_0 = arith.constant 0 : i32
    %3 = arith.index_cast %c0_i32_0 : i32 to index
    %4 = arith.index_cast %1 : i32 to index
    %c0 = arith.constant 0 : index
    %5 = vector.load %arg1[%3, %4, %c0] : memref<8x8x128xf32, #tpu.memory_space<vmem>>, vector<1x8x128xf32>
    %cst_1 = arith.constant 0.818730771 : f32
    %6 = vector.broadcast %cst_1 : f32 to vector<1x8x128xf32>
    %7 = arith.mulf %6, %2 : vector<1x8x128xf32>
    %cst_2 = arith.constant 0.181269243 : f32
    %8 = vector.broadcast %cst_2 : f32 to vector<1x8x128xf32>
    %9 = arith.mulf %8, %5 : vector<1x8x128xf32>
    %10 = arith.addf %7, %9 : vector<1x8x128xf32>
    %cst_3 = arith.constant 9.000000e-02 : f32
    %11 = vector.broadcast %cst_3 : f32 to vector<1x8x128xf32>
    %12 = arith.cmpf oge, %10, %11 : vector<1x8x128xf32>
    %cst_4 = arith.constant 6.000000e+00 : f32
    %cst_5 = arith.constant 0.000000e+00 : f32
    %13 = vector.broadcast %cst_4 : f32 to vector<1x8x128xf32>
    %14 = vector.broadcast %cst_5 : f32 to vector<1x8x128xf32>
    %15 = arith.select %12, %13, %14 : vector<1x8x128xi1>, vector<1x8x128xf32>
    %16 = arith.index_cast %c0_i32_0 : i32 to index
    %17 = arith.index_cast %1 : i32 to index
    %c0_6 = arith.constant 0 : index
    %18 = vector.load %arg2[%16, %17, %c0_6] : memref<8x8x128xf32, #tpu.memory_space<vmem>>, vector<1x8x128xf32>
    tpu.vector_store %arg2[%16, %17, %c0_6], %15 {strides = array<i32>} : memref<8x8x128xf32, #tpu.memory_space<vmem>>, vector<1x8x128xf32>,
    %cst_7 = arith.constant 3.000000e-01 : f32
    %cst_8 = arith.constant 0.000000e+00 : f32
    %19 = vector.broadcast %cst_7 : f32 to vector<1x8x128xf32>
    %20 = vector.broadcast %cst_8 : f32 to vector<1x8x128xf32>
    %21 = arith.select %12, %19, %20 : vector<1x8x128xi1>, vector<1x8x128xf32>
    %22 = arith.subf %10, %21 : vector<1x8x128xf32>
    %c1_i32 = arith.constant 1 : i32
    %23 = arith.index_cast %c1_i32 : i32 to index
    %24 = arith.index_cast %1 : i32 to index
    %c0_9 = arith.constant 0 : index
    %25 = vector.load %arg1[%23, %24, %c0_9] : memref<8x8x128xf32, #tpu.memory_space<vmem>>, vector<1x8x128xf32>
    %cst_10 = arith.constant 0.818730771 : f32
    %26 = vector.broadcast %cst_10 : f32 to vector<1x8x128xf32>
    %27 = arith.mulf %26, %22 : vector<1x8x128xf32>
    %cst_11 = arith.constant 0.181269243 : f32
    %28 = vector.broadcast %cst_11 : f32 to vector<1x8x128xf32>
    %29 = arith.mulf %28, %25 : vector<1x8x128xf32>
    %30 = arith.addf %27, %29 : vector<1x8x128xf32>
    %cst_12 = arith.constant 9.000000e-02 : f32
    %31 = vector.broadcast %cst_12 : f32 to vector<1x8x128xf32>
    %32 = arith.cmpf oge, %30, %31 : vector<1x8x128xf32>
    %cst_13 = arith.constant 6.000000e+00 : f32
    %cst_14 = arith.constant 0.000000e+00 : f32
    %33 = vector.broadcast %cst_13 : f32 to vector<1x8x128xf32>
    %34 = vector.broadcast %cst_14 : f32 to vector<1x8x128xf32>
    %35 = arith.select %32, %33, %34 : vector<1x8x128xi1>, vector<1x8x128xf32>
    %36 = arith.index_cast %c1_i32 : i32 to index
    %37 = arith.index_cast %1 : i32 to index
    %c0_15 = arith.constant 0 : index
    %38 = vector.load %arg2[%36, %37, %c0_15] : memref<8x8x128xf32, #tpu.memory_space<vmem>>, vector<1x8x128xf32>
    tpu.vector_store %arg2[%36, %37, %c0_15], %35 {strides = array<i32>} : memref<8x8x128xf32, #tpu.memory_space<vmem>>, vector<1x8x128xf32>,
    %cst_16 = arith.constant 3.000000e-01 : f32
    %cst_17 = arith.constant 0.000000e+00 : f32
    %39 = vector.broadcast %cst_16 : f32 to vector<1x8x128xf32>
    %40 = vector.broadcast %cst_17 : f32 to vector<1x8x128xf32>
    %41 = arith.select %32, %39, %40 : vector<1x8x128xi1>, vector<1x8x128xf32>
    %42 = arith.subf %30, %41 : vector<1x8x128xf32>
    %c2_i32 = arith.constant 2 : i32
    %43 = arith.index_cast %c2_i32 : i32 to index
    %44 = arith.index_cast %1 : i32 to index
    %c0_18 = arith.constant 0 : index
    %45 = vector.load %arg1[%43, %44, %c0_18] : memref<8x8x128xf32, #tpu.memory_space<vmem>>, vector<1x8x128xf32>
    %cst_19 = arith.constant 0.818730771 : f32
    %46 = vector.broadcast %cst_19 : f32 to vector<1x8x128xf32>
    %47 = arith.mulf %46, %42 : vector<1x8x128xf32>
    %cst_20 = arith.constant 0.181269243 : f32
    %48 = vector.broadcast %cst_20 : f32 to vector<1x8x128xf32>
    %49 = arith.mulf %48, %45 : vector<1x8x128xf32>
    %50 = arith.addf %47, %49 : vector<1x8x128xf32>
    %cst_21 = arith.constant 9.000000e-02 : f32
    %51 = vector.broadcast %cst_21 : f32 to vector<1x8x128xf32>
    %52 = arith.cmpf oge, %50, %51 : vector<1x8x128xf32>
    %cst_22 = arith.constant 6.000000e+00 : f32
    %cst_23 = arith.constant 0.000000e+00 : f32
    %53 = vector.broadcast %cst_22 : f32 to vector<1x8x128xf32>
    %54 = vector.broadcast %cst_23 : f32 to vector<1x8x128xf32>
    %55 = arith.select %52, %53, %54 : vector<1x8x128xi1>, vector<1x8x128xf32>
    %56 = arith.index_cast %c2_i32 : i32 to index
    %57 = arith.index_cast %1 : i32 to index
    %c0_24 = arith.constant 0 : index
    %58 = vector.load %arg2[%56, %57, %c0_24] : memref<8x8x128xf32, #tpu.memory_space<vmem>>, vector<1x8x128xf32>
    tpu.vector_store %arg2[%56, %57, %c0_24], %55 {strides = array<i32>} : memref<8x8x128xf32, #tpu.memory_space<vmem>>, vector<1x8x128xf32>,
    %cst_25 = arith.constant 3.000000e-01 : f32
    %cst_26 = arith.constant 0.000000e+00 : f32
    %59 = vector.broadcast %cst_25 : f32 to vector<1x8x128xf32>
    %60 = vector.broadcast %cst_26 : f32 to vector<1x8x128xf32>
    %61 = arith.select %52, %59, %60 : vector<1x8x128xi1>, vector<1x8x128xf32>
    %62 = arith.subf %50, %61 : vector<1x8x128xf32>
    %c3_i32 = arith.constant 3 : i32
    %63 = arith.index_cast %c3_i32 : i32 to index
    %64 = arith.index_cast %1 : i32 to index
    %c0_27 = arith.constant 0 : index
    %65 = vector.load %arg1[%63, %64, %c0_27] : memref<8x8x128xf32, #tpu.memory_space<vmem>>, vector<1x8x128xf32>
    %cst_28 = arith.constant 0.818730771 : f32
    %66 = vector.broadcast %cst_28 : f32 to vector<1x8x128xf32>
    %67 = arith.mulf %66, %62 : vector<1x8x128xf32>
    %cst_29 = arith.constant 0.181269243 : f32
    %68 = vector.broadcast %cst_29 : f32 to vector<1x8x128xf32>
    %69 = arith.mulf %68, %65 : vector<1x8x128xf32>
    %70 = arith.addf %67, %69 : vector<1x8x128xf32>
    %cst_30 = arith.constant 9.000000e-02 : f32
    %71 = vector.broadcast %cst_30 : f32 to vector<1x8x128xf32>
    %72 = arith.cmpf oge, %70, %71 : vector<1x8x128xf32>
    %cst_31 = arith.constant 6.000000e+00 : f32
    %cst_32 = arith.constant 0.000000e+00 : f32
    %73 = vector.broadcast %cst_31 : f32 to vector<1x8x128xf32>
    %74 = vector.broadcast %cst_32 : f32 to vector<1x8x128xf32>
    %75 = arith.select %72, %73, %74 : vector<1x8x128xi1>, vector<1x8x128xf32>
    %76 = arith.index_cast %c3_i32 : i32 to index
    %77 = arith.index_cast %1 : i32 to index
    %c0_33 = arith.constant 0 : index
    %78 = vector.load %arg2[%76, %77, %c0_33] : memref<8x8x128xf32, #tpu.memory_space<vmem>>, vector<1x8x128xf32>
    tpu.vector_store %arg2[%76, %77, %c0_33], %75 {strides = array<i32>} : memref<8x8x128xf32, #tpu.memory_space<vmem>>, vector<1x8x128xf32>,
    %cst_34 = arith.constant 3.000000e-01 : f32
    %cst_35 = arith.constant 0.000000e+00 : f32
    %79 = vector.broadcast %cst_34 : f32 to vector<1x8x128xf32>
    %80 = vector.broadcast %cst_35 : f32 to vector<1x8x128xf32>
    %81 = arith.select %72, %79, %80 : vector<1x8x128xi1>, vector<1x8x128xf32>
    %82 = arith.subf %70, %81 : vector<1x8x128xf32>
    %c4_i32 = arith.constant 4 : i32
    %83 = arith.index_cast %c4_i32 : i32 to index
    %84 = arith.index_cast %1 : i32 to index
    %c0_36 = arith.constant 0 : index
    %85 = vector.load %arg1[%83, %84, %c0_36] : memref<8x8x128xf32, #tpu.memory_space<vmem>>, vector<1x8x128xf32>
    %cst_37 = arith.constant 0.818730771 : f32
    %86 = vector.broadcast %cst_37 : f32 to vector<1x8x128xf32>
    %87 = arith.mulf %86, %82 : vector<1x8x128xf32>
    %cst_38 = arith.constant 0.181269243 : f32
    %88 = vector.broadcast %cst_38 : f32 to vector<1x8x128xf32>
    %89 = arith.mulf %88, %85 : vector<1x8x128xf32>
    %90 = arith.addf %87, %89 : vector<1x8x128xf32>
    %cst_39 = arith.constant 9.000000e-02 : f32
    %91 = vector.broadcast %cst_39 : f32 to vector<1x8x128xf32>
    %92 = arith.cmpf oge, %90, %91 : vector<1x8x128xf32>
    %cst_40 = arith.constant 6.000000e+00 : f32
    %cst_41 = arith.constant 0.000000e+00 : f32
    %93 = vector.broadcast %cst_40 : f32 to vector<1x8x128xf32>
    %94 = vector.broadcast %cst_41 : f32 to vector<1x8x128xf32>
    %95 = arith.select %92, %93, %94 : vector<1x8x128xi1>, vector<1x8x128xf32>
    %96 = arith.index_cast %c4_i32 : i32 to index
    %97 = arith.index_cast %1 : i32 to index
    %c0_42 = arith.constant 0 : index
    %98 = vector.load %arg2[%96, %97, %c0_42] : memref<8x8x128xf32, #tpu.memory_space<vmem>>, vector<1x8x128xf32>
    tpu.vector_store %arg2[%96, %97, %c0_42], %95 {strides = array<i32>} : memref<8x8x128xf32, #tpu.memory_space<vmem>>, vector<1x8x128xf32>,
    %cst_43 = arith.constant 3.000000e-01 : f32
    %cst_44 = arith.constant 0.000000e+00 : f32
    %99 = vector.broadcast %cst_43 : f32 to vector<1x8x128xf32>
    %100 = vector.broadcast %cst_44 : f32 to vector<1x8x128xf32>
    %101 = arith.select %92, %99, %100 : vector<1x8x128xi1>, vector<1x8x128xf32>
    %102 = arith.subf %90, %101 : vector<1x8x128xf32>
    %c5_i32 = arith.constant 5 : i32
    %103 = arith.index_cast %c5_i32 : i32 to index
    %104 = arith.index_cast %1 : i32 to index
    %c0_45 = arith.constant 0 : index
    %105 = vector.load %arg1[%103, %104, %c0_45] : memref<8x8x128xf32, #tpu.memory_space<vmem>>, vector<1x8x128xf32>
    %cst_46 = arith.constant 0.818730771 : f32
    %106 = vector.broadcast %cst_46 : f32 to vector<1x8x128xf32>
    %107 = arith.mulf %106, %102 : vector<1x8x128xf32>
    %cst_47 = arith.constant 0.181269243 : f32
    %108 = vector.broadcast %cst_47 : f32 to vector<1x8x128xf32>
    %109 = arith.mulf %108, %105 : vector<1x8x128xf32>
    %110 = arith.addf %107, %109 : vector<1x8x128xf32>
    %cst_48 = arith.constant 9.000000e-02 : f32
    %111 = vector.broadcast %cst_48 : f32 to vector<1x8x128xf32>
    %112 = arith.cmpf oge, %110, %111 : vector<1x8x128xf32>
    %cst_49 = arith.constant 6.000000e+00 : f32
    %cst_50 = arith.constant 0.000000e+00 : f32
    %113 = vector.broadcast %cst_49 : f32 to vector<1x8x128xf32>
    %114 = vector.broadcast %cst_50 : f32 to vector<1x8x128xf32>
    %115 = arith.select %112, %113, %114 : vector<1x8x128xi1>, vector<1x8x128xf32>
    %116 = arith.index_cast %c5_i32 : i32 to index
    %117 = arith.index_cast %1 : i32 to index
    %c0_51 = arith.constant 0 : index
    %118 = vector.load %arg2[%116, %117, %c0_51] : memref<8x8x128xf32, #tpu.memory_space<vmem>>, vector<1x8x128xf32>
    tpu.vector_store %arg2[%116, %117, %c0_51], %115 {strides = array<i32>} : memref<8x8x128xf32, #tpu.memory_space<vmem>>, vector<1x8x128xf32>,
    %cst_52 = arith.constant 3.000000e-01 : f32
    %cst_53 = arith.constant 0.000000e+00 : f32
    %119 = vector.broadcast %cst_52 : f32 to vector<1x8x128xf32>
    %120 = vector.broadcast %cst_53 : f32 to vector<1x8x128xf32>
    %121 = arith.select %112, %119, %120 : vector<1x8x128xi1>, vector<1x8x128xf32>
    %122 = arith.subf %110, %121 : vector<1x8x128xf32>
    %c6_i32 = arith.constant 6 : i32
    %123 = arith.index_cast %c6_i32 : i32 to index
    %124 = arith.index_cast %1 : i32 to index
    %c0_54 = arith.constant 0 : index
    %125 = vector.load %arg1[%123, %124, %c0_54] : memref<8x8x128xf32, #tpu.memory_space<vmem>>, vector<1x8x128xf32>
    %cst_55 = arith.constant 0.818730771 : f32
    %126 = vector.broadcast %cst_55 : f32 to vector<1x8x128xf32>
    %127 = arith.mulf %126, %122 : vector<1x8x128xf32>
    %cst_56 = arith.constant 0.181269243 : f32
    %128 = vector.broadcast %cst_56 : f32 to vector<1x8x128xf32>
    %129 = arith.mulf %128, %125 : vector<1x8x128xf32>
    %130 = arith.addf %127, %129 : vector<1x8x128xf32>
    %cst_57 = arith.constant 9.000000e-02 : f32
    %131 = vector.broadcast %cst_57 : f32 to vector<1x8x128xf32>
    %132 = arith.cmpf oge, %130, %131 : vector<1x8x128xf32>
    %cst_58 = arith.constant 6.000000e+00 : f32
    %cst_59 = arith.constant 0.000000e+00 : f32
    %133 = vector.broadcast %cst_58 : f32 to vector<1x8x128xf32>
    %134 = vector.broadcast %cst_59 : f32 to vector<1x8x128xf32>
    %135 = arith.select %132, %133, %134 : vector<1x8x128xi1>, vector<1x8x128xf32>
    %136 = arith.index_cast %c6_i32 : i32 to index
    %137 = arith.index_cast %1 : i32 to index
    %c0_60 = arith.constant 0 : index
    %138 = vector.load %arg2[%136, %137, %c0_60] : memref<8x8x128xf32, #tpu.memory_space<vmem>>, vector<1x8x128xf32>
    tpu.vector_store %arg2[%136, %137, %c0_60], %135 {strides = array<i32>} : memref<8x8x128xf32, #tpu.memory_space<vmem>>, vector<1x8x128xf32>,
    %cst_61 = arith.constant 3.000000e-01 : f32
    %cst_62 = arith.constant 0.000000e+00 : f32
    %139 = vector.broadcast %cst_61 : f32 to vector<1x8x128xf32>
    %140 = vector.broadcast %cst_62 : f32 to vector<1x8x128xf32>
    %141 = arith.select %132, %139, %140 : vector<1x8x128xi1>, vector<1x8x128xf32>
    %142 = arith.subf %130, %141 : vector<1x8x128xf32>
    %c7_i32 = arith.constant 7 : i32
    %143 = arith.index_cast %c7_i32 : i32 to index
    %144 = arith.index_cast %1 : i32 to index
    %c0_63 = arith.constant 0 : index
    %145 = vector.load %arg1[%143, %144, %c0_63] : memref<8x8x128xf32, #tpu.memory_space<vmem>>, vector<1x8x128xf32>
    %cst_64 = arith.constant 0.818730771 : f32
    %146 = vector.broadcast %cst_64 : f32 to vector<1x8x128xf32>
    %147 = arith.mulf %146, %142 : vector<1x8x128xf32>
    %cst_65 = arith.constant 0.181269243 : f32
    %148 = vector.broadcast %cst_65 : f32 to vector<1x8x128xf32>
    %149 = arith.mulf %148, %145 : vector<1x8x128xf32>
    %150 = arith.addf %147, %149 : vector<1x8x128xf32>
    %cst_66 = arith.constant 9.000000e-02 : f32
    %151 = vector.broadcast %cst_66 : f32 to vector<1x8x128xf32>
    %152 = arith.cmpf oge, %150, %151 : vector<1x8x128xf32>
    %cst_67 = arith.constant 6.000000e+00 : f32
    %cst_68 = arith.constant 0.000000e+00 : f32
    %153 = vector.broadcast %cst_67 : f32 to vector<1x8x128xf32>
    %154 = vector.broadcast %cst_68 : f32 to vector<1x8x128xf32>
    %155 = arith.select %152, %153, %154 : vector<1x8x128xi1>, vector<1x8x128xf32>
    %156 = arith.index_cast %c7_i32 : i32 to index
    %157 = arith.index_cast %1 : i32 to index
    %c0_69 = arith.constant 0 : index
    %158 = vector.load %arg2[%156, %157, %c0_69] : memref<8x8x128xf32, #tpu.memory_space<vmem>>, vector<1x8x128xf32>
    tpu.vector_store %arg2[%156, %157, %c0_69], %155 {strides = array<i32>} : memref<8x8x128xf32, #tpu.memory_space<vmem>>, vector<1x8x128xf32>,
    %cst_70 = arith.constant 3.000000e-01 : f32
    %cst_71 = arith.constant 0.000000e+00 : f32
    %159 = vector.broadcast %cst_70 : f32 to vector<1x8x128xf32>
    %160 = vector.broadcast %cst_71 : f32 to vector<1x8x128xf32>
    %161 = arith.select %152, %159, %160 : vector<1x8x128xi1>, vector<1x8x128xf32>
    %162 = arith.subf %150, %161 : vector<1x8x128xf32>
    %c8_i32_72 = arith.constant 8 : i32
    %c1_i32_73 = arith.constant 1 : i32
    return
  }
  func.func @transform_0(%arg0: i32) -> (i32, i32, i32) {
    %c0_i32 = arith.constant 0 : i32
    %c0_i32_0 = arith.constant 0 : i32
    %c0_i32_1 = arith.constant 0 : i32
    return %c0_i32, %arg0, %c0_i32_0 : i32, i32, i32
  }
  func.func @transform_1(%arg0: i32) -> (i32, i32, i32) {
    %c0_i32 = arith.constant 0 : i32
    %c0_i32_0 = arith.constant 0 : i32
    %c0_i32_1 = arith.constant 0 : i32
    return %c0_i32, %arg0, %c0_i32_0 : i32, i32, i32
  }
}

</mosaic_0001>

<bundles_post_ra>
// kernel: tpu_custom_call.1
= control target key start
LH: loop header
LB: loop body
LE: loop exit
PB: predicated region body
PF: predicated region fallthrough
CT: control target
= control target key end

     0   :  { %6 = vsyncpa [#allocation3], 0  ;;  %s720_s0 = inlined_call_operand.hbm [shape: f32[8,16,128], index: 0, kind: input, shape index: {}]   ;;  %s721_s1 = inlined_call_operand.hbm [shape: f32[8,16,128], index: 1, kind: output, shape index: {}]  }
   0x1   :  { %8 = vsyncpa [#allocation3 + $0x1], 0 }
   0x2   :  { %9 = vsyncpa [#allocation4], 0 }
   0x3   :  { %11 = vsyncpa [#allocation4 + $0x1], 0  ;;  %s520_s6 = smov 0   ;;  %s522_s7 = smov 0  }
   0x4   :  { %s524_s8 = smov 0   ;;  %s526_s9 = smov 0  }
   0x5 LB: > { %s541_s10 = sadd.s32 4294967295, %s499_s9   ;;  %s324_s11 = sadd.s32 4294967294, %s499_s9   ;;  %s499_s9 = sphi %s526_s9, %s735_s9   ;;  %s495_s8 = sphi %s524_s8, %s734_s8   ;;  %s491_s7 = sphi %s522_s7, %s733_s7   ;;  %s487_s6 = sphi %s520_s6, %s732_s6  }
   0x6   : > { %s545_s12 = sadd.s32 1, %s499_s9   ;;  %s24_s13 = sadd.s32 1, %s495_s8 }
   0x7   : > { %s21_s14 = ssub.s32 %s499_s9, %s545_s12  ;;  %p31_p0 = scmp.ne.s32.totalorder %s495_s8, %s491_s7 }
   0x8   : > { %p22_p1 = scmp.eq.s32.totalorder %s21_s14, 0  ;;  %p32_p2 = scmp.eq.s32.totalorder %s499_s9, 0 }
   0x9   : > { %p37_p3 = scmp.ne.s32.totalorder %s491_s7, %s487_s6  ;;  %p38_p4 = scmp.eq.s32.totalorder %s541_s10, 0 }
   0xa   : > { %s557_s15 = scalar_select %p22_p1, %s495_s8, %s24_s13  }
   0xb   : > { %p559_p5 = por %p32_p2, %p31_p0  ;;  %p563_p6 = por %p38_p4, %p37_p3 }
   0xc   : > { %p61_p7 = scmp.eq.s32.totalorder %s541_s10, 1  ;;  %p67_p8 = scmp.eq.s32.totalorder %s324_s11, 1 }
   0xd   : > { %p362_p10 = scmp.lt.s32.totalorder %s499_s9, 2  ;;  %s87_s20 = sand.u32 1, %s495_s8  }
   0xe   : > { %p570_p11 = por %p61_p7, %p31_p0  ;;  %p574_p12 = por %p67_p8, %p37_p3 }
   0xf   : > { %s328_s21 = sshll.u32 %s499_s9, 7  ;;  %s327_s22 = sshll.u32 %s87_s20, 6 }
  0x10   : > { %s725_s18 = scalar_select %p570_p11, 1, 0 }
  0x11   : > { %s726_s19 = scalar_select %p574_p12, 1, 0 }
  0x12   : > { %s583_s25 = scalar_lea.hbm %s720_s0, %s328_s21  ;;  %s91_s26 = scalar_lea.vmem [#allocation2], %s327_s22 }
  0x13   : > { %s97_s27 = sshll.u32 %s91_s26, 4  ;;  %p587_p13 = pnand %p362_p10, %p559_p5  ;;  %s591_s27 = int_to_ptr.vmem [resolvable:$true] %s97_s27 }
  0x14   : > { %s594_s29 = scalar_lea.sflag [#allocation3], %s87_s20  ;;  %s403_s30 = scalar_lea.hbm %s583_s25, 1024 }
  0x15   : > { %p404_p1 = scmp.ne.s32.totalorder %s583_s25, %s403_s30  ;;  %p405_p2 = pneg %p587_p13 }
  0x16   : > { %s408_s4 = scalar_lea.hbm %s720_s0, 2048  ;;  %p409_p5 = scmp.lt.u32.totalorder %s583_s25, %s720_s0 }
  0x17   : > { %p406_p3 = pnand %p405_p2, %p404_p1  ;;  %p410_p7 = scmp.lt.u32.totalorder %s408_s4, %s403_s30 }
  0x18   : > { %p412_p10 = scmp.lt.u32.totalorder %s403_s30, %s583_s25 }
  0x19   : > { %p407_p4 = pneg %p406_p3  ;;  %p411_p8 = por %p410_p7, %p409_p5 }
  0x1b   : > { %p413_p9 = por %p412_p10, %p411_p8 }
  0x1d   : > { %p414_p0 = pnand %p413_p9, %p407_p4 }
  0x1f   : > { %417 = shalt.err (!%p414_p0)
}
  0x20   : > { %s418_s13 = scalar_lea.vmem %s591_s27, 1024  ;;  %s501_s14 = smov [#allocation2]  }
  0x21   : > { %p419_p1 = scmp.ne.s32.totalorder %s591_s27, %s418_s13  ;;  %s423_s16 = sshll.u32 %s501_s14, 4  ;;  %s424_s16 = int_to_ptr.vmem [resolvable:$false] %s423_s16 }
  0x22   : > { %s425_s20 = scalar_lea.vmem %s424_s16, 2048  ;;  %p426_p11 = scmp.lt.s32.totalorder %s591_s27, %s424_s16 }
  0x23   : > { %p421_p3 = pnand %p419_p1, %p405_p2  ;;  %p427_p5 = scmp.lt.s32.totalorder %s425_s20, %s418_s13 }
  0x25   : > { %p422_p12 = pneg %p421_p3  ;;  %p428_p7 = por %p427_p5, %p426_p11 }
  0x27   : > { %p429_p8 = pnand %p428_p7, %p422_p12 }
  0x29   : > { %432 = shalt.err (!%p429_p8)
}
  0x2a   : > { %s502_s21 = smov 256   ;;  %s503_s22 = smov 128  }
  0x2b   : > { %s504_s23 = smov 8   ;;  %p105_p9 = scmp.lt.s32.totalorder %s499_s9, 3 }
  0x2c   : > { %357 = dma.hbm_to_vmem [thread:$0]  (!%p587_p13), %s583_s25, 1024, %s591_s27, %s594_s29, %s502_s21, %s503_s22, %s504_s23  }
  0x2d   : > { %p728_p0 = scmp.ge.s32.totalorder %s499_s9, 1 }
  0x2f   : > { %p106_p2 = pnand %p728_p0, %p105_p9 }
  0x30   : > { %s626_s24 = sand.u32 (!%p106_p2), 1, %s491_s7  }
  0x31   : > { %109 = sbr.rel (%p106_p2) target bundleno = 134 (0x86), region = 24  ;;  %s330_s26 = sshll.u32 (!%p106_p2), %s626_s24, 6 }
  0x32   : > { %s112_s30 = scalar_lea.sflag (!%p106_p2), [#allocation3], %s626_s24  ;;  %s630_s2 = scalar_lea.vmem (!%p106_p2), [#allocation2], %s330_s26 }
  0x38   : > { %478 = dma.done.wait (%p563_p6), %s112_s30, 1024  }
  0x39   : > { %480 = vsyncadd (%p563_p6), %s112_s30, 4294966272  ;;  %v134_v0 = vld [vmem:[%s630_s2] sm:$0xff]  ;;  %v332_v2 = vld [vmem:[%s630_s2 + $0x8] sm:$0xff]  ;;  %v505_v3 = vmov 0.0   ;;  %s640_s25 = scalar_lea.vmem [#allocation5], %s330_s26  ;;  %s347_s27 = sshll.u32 %s541_s10, 7 }
  0x3a   : > { %v135_v1 = vmul.f32 0.18126924, %v134_v0  ;;  %v146_v7 = vmul.f32 0.18126924, %v332_v2  ;;  %v334_v10 = vld [vmem:[%s630_s2 + $0x10] sm:$0xff]  ;;  %v336_v17 = vld [vmem:[%s630_s2 + $0x18] sm:$0xff]  ;;  %s674_s3 = scalar_lea.hbm %s721_s1, %s347_s27 }
  0x3b   : > { %v158_v14 = vmul.f32 0.18126924, %v334_v10  ;;  %v170_v21 = vmul.f32 0.18126924, %v336_v17  ;;  %v338_v24 = vld [vmem:[%s630_s2 + $0x20] sm:$0xff]  ;;  %v340_v31 = vld [vmem:[%s630_s2 + $0x28] sm:$0xff] }
  0x3c   : > { %vm137_vm0 = vcmp.ge.f32.partialorder %v135_v1, 0.09  ;;  %v182_v28 = vmul.f32 0.18126924, %v338_v24  ;;  %v194_v35 = vmul.f32 0.18126924, %v340_v31 }
  0x3d   : > { %v138_v4 = vsel %vm137_vm0, 6.0, %v505_v3  ;;  %v140_v5 = vsel %vm137_vm0, 0.3, %v505_v3  ;;  %v342_v38 = vld [vmem:[%s630_s2 + $0x30] sm:$0xff]  ;;  %v344_v45 = vld [vmem:[%s630_s2 + $0x38] sm:$0xff]  ;;  %s237_s17 = sshll.u32 %s640_s25, 4  ;;  %s669_s17 = int_to_ptr.vmem [resolvable:$true] %s237_s17 }
  0x3e   : > { %139 = vst [vmem:[%s640_s25] sm:$0xff] %v138_v4  ;;  %v141_v6 = vsub.f32 %v135_v1, %v140_v5  ;;  %v206_v42 = vmul.f32 0.18126924, %v342_v38  ;;  %v218_v49 = vmul.f32 0.18126924, %v344_v45  ;;  %s225_s4 = scalar_lea.sflag [#allocation4], %s626_s24  ;;  %s433_s5 = scalar_lea.vmem %s669_s17, 1024 }
  0x3f   : > { %p434_p6 = scmp.ne.s32.totalorder %s669_s17, %s433_s5  ;;  %p729_p11 = scmp.ne.s32.totalorder %s725_s18, 0 }
  0x40   : > { %v145_v8 = vmul.f32 0.8187308, %v141_v6  ;;  %s506_s10 = smov [#allocation5]  }
  0x41   : > { %p435_p12 = pnand %p434_p6, %p729_p11  ;;  %s437_s11 = sshll.u32 %s506_s10, 4  ;;  %s438_s11 = int_to_ptr.vmem [resolvable:$false] %s437_s11 }
  0x42   : > { %v147_v9 = vadd.f32 %v146_v7, %v145_v8  ;;  %s439_s13 = scalar_lea.vmem %s438_s11, 2048  ;;  %p440_p4 = scmp.lt.s32.totalorder %s669_s17, %s438_s11 }
  0x43   : > { %p436_p13 = pneg %p435_p12  ;;  %p441_p10 = scmp.lt.s32.totalorder %s439_s13, %s433_s5 }
  0x44   : > { %vm148_vm1 = vcmp.ge.f32.partialorder %v147_v9, 0.09 }
  0x45   : > { %v149_v11 = vsel %vm148_vm1, 6.0, %v505_v3  ;;  %v152_v12 = vsel %vm148_vm1, 0.3, %v505_v3  ;;  %p442_p1 = por %p441_p10, %p440_p4 }
  0x46   : > { %333 = vst [vmem:[%s640_s25 + $0x8] sm:$0xff] %v149_v11  ;;  %v153_v13 = vsub.f32 %v147_v9, %v152_v12 }
  0x47   : > { %p443_p3 = pnand %p442_p1, %p436_p13 }
  0x48   : > { %v157_v15 = vmul.f32 0.8187308, %v153_v13 }
  0x4a   : > { %v159_v16 = vadd.f32 %v158_v14, %v157_v15 }
  0x4c   : > { %vm160_vm2 = vcmp.ge.f32.partialorder %v159_v16, 0.09 }
  0x4d   : > { %v161_v18 = vsel %vm160_vm2, 6.0, %v505_v3  ;;  %v164_v19 = vsel %vm160_vm2, 0.3, %v505_v3 }
  0x4e   : > { %335 = vst [vmem:[%s640_s25 + $0x10] sm:$0xff] %v161_v18  ;;  %v165_v20 = vsub.f32 %v159_v16, %v164_v19 }
  0x50   : > { %v169_v22 = vmul.f32 0.8187308, %v165_v20 }
  0x52   : > { %v171_v23 = vadd.f32 %v170_v21, %v169_v22 }
  0x54   : > { %vm172_vm3 = vcmp.ge.f32.partialorder %v171_v23, 0.09 }
  0x55   : > { %v173_v25 = vsel %vm172_vm3, 6.0, %v505_v3  ;;  %v176_v26 = vsel %vm172_vm3, 0.3, %v505_v3 }
  0x56   : > { %337 = vst [vmem:[%s640_s25 + $0x18] sm:$0xff] %v173_v25  ;;  %v177_v27 = vsub.f32 %v171_v23, %v176_v26 }
  0x58   : > { %v181_v29 = vmul.f32 0.8187308, %v177_v27 }
  0x5a   : > { %v183_v30 = vadd.f32 %v182_v28, %v181_v29 }
  0x5c   : > { %vm184_vm4 = vcmp.ge.f32.partialorder %v183_v30, 0.09 }
  0x5d   : > { %v185_v32 = vsel %vm184_vm4, 6.0, %v505_v3  ;;  %v188_v33 = vsel %vm184_vm4, 0.3, %v505_v3 }
  0x5e   : > { %339 = vst [vmem:[%s640_s25 + $0x20] sm:$0xff] %v185_v32  ;;  %v189_v34 = vsub.f32 %v183_v30, %v188_v33 }
  0x60   : > { %v193_v36 = vmul.f32 0.8187308, %v189_v34 }
  0x62   : > { %v195_v37 = vadd.f32 %v194_v35, %v193_v36 }
  0x64   : > { %vm196_vm5 = vcmp.ge.f32.partialorder %v195_v37, 0.09 }
  0x65   : > { %v197_v39 = vsel %vm196_vm5, 6.0, %v505_v3  ;;  %v200_v40 = vsel %vm196_vm5, 0.3, %v505_v3 }
  0x66   : > { %341 = vst [vmem:[%s640_s25 + $0x28] sm:$0xff] %v197_v39  ;;  %v201_v41 = vsub.f32 %v195_v37, %v200_v40 }
  0x68   : > { %v205_v43 = vmul.f32 0.8187308, %v201_v41 }
  0x6a   : > { %v207_v44 = vadd.f32 %v206_v42, %v205_v43 }
  0x6c   : > { %vm208_vm6 = vcmp.ge.f32.partialorder %v207_v44, 0.09 }
  0x6d   : > { %v209_v46 = vsel %vm208_vm6, 6.0, %v505_v3  ;;  %v212_v47 = vsel %vm208_vm6, 0.3, %v505_v3 }
  0x6e   : > { %343 = vst [vmem:[%s640_s25 + $0x30] sm:$0xff] %v209_v46  ;;  %v213_v48 = vsub.f32 %v207_v44, %v212_v47 }
  0x70   : > { %v217_v50 = vmul.f32 0.8187308, %v213_v48 }
  0x72   : > { %v219_v51 = vadd.f32 %v218_v49, %v217_v50 }
  0x74   : > { %vm220_vm7 = vcmp.ge.f32.partialorder %v219_v51, 0.09 }
  0x75   : > { %v221_v52 = vsel %vm220_vm7, 6.0, %v505_v3 }
  0x76   : > { %345 = vst [vmem:[%s640_s25 + $0x38] sm:$0xff] %v221_v52 }
  0x77   : > { %446 = shalt.err (!%p443_p3)
}
  0x78   : > { %s447_s14 = scalar_lea.hbm %s674_s3, 1024  ;;  %s451_s21 = scalar_lea.hbm %s721_s1, 2048 }
  0x79   : > { %p448_p5 = scmp.ne.s32.totalorder %s674_s3, %s447_s14  ;;  %p452_p9 = scmp.lt.u32.totalorder %s674_s3, %s721_s1 }
  0x7a   : > { %p453_p0 = scmp.lt.u32.totalorder %s451_s21, %s447_s14  ;;  %p455_p6 = scmp.lt.u32.totalorder %s447_s14, %s674_s3 }
  0x7b   : > { %p449_p7 = pnand %p448_p5, %p729_p11 }
  0x7c   : > { %p454_p2 = por %p453_p0, %p452_p9 }
  0x7d   : > { %p450_p8 = pneg %p449_p7 }
  0x7e   : > { %p456_p12 = por %p455_p6, %p454_p2 }
  0x80   : > { %p457_p13 = pnand %p456_p12, %p450_p8 }
  0x82   : > { %460 = shalt.err (!%p457_p13)
}
  0x83   : > { %s507_s26 = smov 128   ;;  %s508_s30 = smov 256  }
  0x84   : > { %s509_s2 = smov 8  }
  0x85   : > { %352 = dma.vmem_to_hbm [thread:$0]  (%p729_p11), %s669_s17, 1024, %s674_s3, %s225_s4, %s507_s26, %s508_s30, %s509_s2  }
  0x86 PF: > { %s252_s25 = sand.u32 1, %s487_s6   ;;  %p730_p4 = scmp.ne.s32.totalorder %s726_s19, 0 }
  0x87   : > { %p731_p10 = scmp.ge.s32.totalorder %s499_s9, 2  ;;  %s253_s27 = scalar_lea.sflag [#allocation4], %s252_s25 }
  0x89   : > { %p359_p1 = pnand %p731_p10, %p730_p4 }
  0x8b   : > { %482 = dma.done.wait (!%p359_p1), %s253_s27, 1024  }
  0x8c   : > { %484 = vsyncadd (!%p359_p1), %s253_s27, 4294966272  ;;  %p14_p3 = scmp.ge.s32.totalorder %s545_s12, 4   ;;  %s732_s6 = smov %s491_s7 }
  0x8d   : > { %s733_s7 = smov %s495_s8  ;;  %s734_s8 = smov %s557_s15 }
  0x8e   : > { %s735_s9 = smov %s545_s12  ;;  %16 = sbr.rel (!%p14_p3) target bundleno = 5 (0x5), region = 83 }
  0x95   :  { %258 = vsyncpa [#allocation3], 1 }
  0x96   :  { %260 = vsyncpa [#allocation3 + $0x1], 1 }
  0x97   :  { %261 = vsyncpa [#allocation4], 1 }
  0x98   :  { %263 = vsyncpa [#allocation4 + $0x1], 1 }

</bundles_post_ra>
